<compile_context>
chip_gen: v6e
topology: v6e:2x2x1
jax: 0.10.0
libtpu: 0.0.40
codegen_flags: <defaults>
</compile_context>

<pallas_src>
import functools

import jax
import jax.numpy as jnp
from jax.experimental import pallas as pl
from jax.experimental.pallas import tpu as pltpu

TM_MM = 256    # matmul row tile (matches 2x256 MXU on v6e/v7x; fine on v5e)
TM_EW = 512    # row tile for the memory-bound elementwise kernel
TK_MAX = 512   # K tile for the matmul reduction axis (bounds VMEM on v7x)


def _round_up(x, m):
    return ((x + m - 1) // m) * m


def _pick_tk(K):
    for tk in (TK_MAX, 256, 128):
        if K % tk == 0:
            return tk
    return K  # small / odd K (e.g. 16*input_nc): keep the whole reduction resident


# ---------------------------------------------------------------------------
# Pallas kernels
# ---------------------------------------------------------------------------
def _conv_mm_kernel(a_ref, w_ref, b_ref, *rest, total_rows, tm, apply_lrelu,
                    with_stats):
    """Tiled matmul + bias (+LeakyReLU) (+per-channel sum/sumsq accumulation)."""
    if with_stats:
        o_ref, sum_ref, ss_ref, acc_ref = rest
    else:
        o_ref, acc_ref = rest
        sum_ref = ss_ref = None

    m = pl.program_id(0)
    k = pl.program_id(1)
    nk = pl.num_programs(1)

    @pl.when(k == 0)
    def _():
        acc_ref[...] = jnp.zeros_like(acc_ref)

    if with_stats:
        @pl.when(jnp.logical_and(m == 0, k == 0))
        def _():
            sum_ref[...] = jnp.zeros_like(sum_ref)
            ss_ref[...] = jnp.zeros_like(ss_ref)

    # bf16 x bf16 -> f32 accumulate on the MXU.
    acc_ref[...] += jnp.dot(a_ref[...], w_ref[...],
                            preferred_element_type=jnp.float32)

    @pl.when(k == nk - 1)
    def _():
        out = acc_ref[...] + b_ref[...]
        if apply_lrelu:
            out = jnp.where(out > 0, out, 0.2 * out)
        o_ref[...] = out.astype(o_ref.dtype)
        if with_stats:
            # Mask rows belonging to the ragged tail so they do not pollute
            # the BatchNorm batch statistics.
            row = m * tm + jax.lax.broadcasted_iota(jnp.int32, out.shape, 0)
            v = jnp.where(row < total_rows, out, 0.0)
            sum_ref[...] += jnp.sum(v, axis=0, keepdims=True)
            ss_ref[...] += jnp.sum(v * v, axis=0, keepdims=True)


def pallas_conv_matmul(a, w, b, *, apply_lrelu, with_stats):
    """a: (M, K) bf16 patches, w: (K, C) bf16, b: (C,) f32.

    Returns (y,) or (y, sum, sumsq) with y: (M, C) f32.
    """
    M, K = a.shape
    _, C = w.shape
    tm = min(TM_MM, _round_up(M, 8))
    tk = _pick_tk(K)
    grid = (pl.cdiv(M, tm), K // tk)

    out_shape = [jax.ShapeDtypeStruct((M, C), jnp.float32)]
    out_specs = [pl.BlockSpec((tm, C), lambda i, j: (i, 0))]
    if with_stats:
        out_shape += [jax.ShapeDtypeStruct((1, C), jnp.float32)] * 2
        out_specs += [pl.BlockSpec((1, C), lambda i, j: (0, 0)),
                      pl.BlockSpec((1, C), lambda i, j: (0, 0))]

    # The stats accumulators stay resident across the M axis, so it must be a
    # sequential ("arbitrary") axis when stats are fused; otherwise let the M
    # axis shard across TensorCores.
    dims = ("arbitrary", "arbitrary") if with_stats else ("parallel", "arbitrary")

    return pl.pallas_call(
        functools.partial(_conv_mm_kernel, total_rows=M, tm=tm,
                          apply_lrelu=apply_lrelu, with_stats=with_stats),
        out_shape=tuple(out_shape),
        grid=grid,
        in_specs=[
            pl.BlockSpec((tm, tk), lambda i, j: (i, j)),
            pl.BlockSpec((tk, C), lambda i, j: (j, 0)),
            pl.BlockSpec((1, C), lambda i, j: (0, 0)),
        ],
        out_specs=tuple(out_specs),
        scratch_shapes=[pltpu.VMEM((tm, C), jnp.float32)],
        compiler_params=pltpu.CompilerParams(dimension_semantics=dims),
    )(a, w, b.reshape(1, C).astype(jnp.float32))


def _scale_shift_lrelu_kernel(y_ref, scale_ref, shift_ref, o_ref):
    v = y_ref[...] * scale_ref[...] + shift_ref[...]
    o_ref[...] = jnp.where(v > 0, v, 0.2 * v)


def pallas_scale_shift_lrelu(y, scale, shift):
    """Per-channel affine (BatchNorm normalize) + LeakyReLU(0.2). y: (M, C) f32."""
    M, C = y.shape
    tm = min(TM_EW, _round_up(M, 8))
    return pl.pallas_call(
        _scale_shift_lrelu_kernel,
        out_shape=jax.ShapeDtypeStruct((M, C), jnp.float32),
        grid=(pl.cdiv(M, tm),),
        in_specs=[
            pl.BlockSpec((tm, C), lambda i: (i, 0)),
            pl.BlockSpec((1, C), lambda i: (0, 0)),
            pl.BlockSpec((1, C), lambda i: (0, 0)),
        ],
        out_specs=pl.BlockSpec((tm, C), lambda i: (i, 0)),
        compiler_params=pltpu.CompilerParams(dimension_semantics=("parallel",)),
    )(y, scale.reshape(1, C).astype(jnp.float32),
      shift.reshape(1, C).astype(jnp.float32))


# ---------------------------------------------------------------------------
# Conv / BatchNorm wrappers (glue: im2col + reshapes in plain JAX, bf16)
# ---------------------------------------------------------------------------
def conv2d(x_nhwc, w_oihw, bias, stride, *, apply_lrelu, with_stats):
    """4x4 conv, padding=1. x: (N,H,W,Cin), w: (Cout,Cin,4,4) [PyTorch layout]."""
    N, H, W, Cin = x_nhwc.shape
    Cout, _, KH, KW = w_oihw.shape
    pad = 1
    # TODO(synk): fuse the 4x4 strided patch gather into the kernel's DMA (needs
    # strided in-block reads that BlockSpec cannot express); for now the patch
    # matrix is materialized once, in bf16, to halve its HBM footprint.
    xp = jnp.pad(x_nhwc, ((0, 0), (pad, pad), (pad, pad), (0, 0)))
    xp = xp.astype(jnp.bfloat16)
    Hout = (H + 2 * pad - KH) // stride + 1
    Wout = (W + 2 * pad - KW) // stride + 1
    cols = [
        xp[:, kh:kh + Hout * stride:stride, kw:kw + Wout * stride:stride, :]
        for kh in range(KH) for kw in range(KW)
    ]
    patches = jnp.concatenate(cols, axis=-1)            # (N,Hout,Wout,KH*KW*Cin) bf16
    a = patches.reshape(N * Hout * Wout, KH * KW * Cin)
    # weight -> (KH,KW,Cin,Cout) -> (K, Cout); matches patch ordering above
    wm = jnp.transpose(w_oihw, (2, 3, 1, 0)).reshape(KH * KW * Cin, Cout)
    wm = wm.astype(jnp.bfloat16)
    if bias is None:
        bias = jnp.zeros((Cout,), jnp.float32)
    outs = pallas_conv_matmul(a, wm, bias, apply_lrelu=apply_lrelu,
                              with_stats=with_stats)
    return outs, (N, Hout, Wout, Cout)


def batchnorm_lrelu(y_flat, s, ss, gamma, beta, eps=1e-5):
    """BatchNorm2d with batch statistics (training-mode forward) + LeakyReLU(0.2).
    y_flat: (M, C); s/ss: (1, C) per-channel sum and sum-of-squares (from the
    fused conv kernel epilogue)."""
    M = y_flat.shape[0]
    mean = s[0] / M
    var = ss[0] / M - mean * mean  # biased variance, as used for normalization
    scale = gamma * jax.lax.rsqrt(var + eps)
    shift = beta - mean * scale
    return pallas_scale_shift_lrelu(y_flat, scale, shift)


# ---------------------------------------------------------------------------
# Full NLayerDiscriminator forward
# ---------------------------------------------------------------------------
def n_layer_discriminator_forward(x_nchw, params, n_layers=3):
    x = jnp.transpose(x_nchw, (0, 2, 3, 1)).astype(jnp.float32)  # NCHW -> NHWC

    # layer 0: conv(stride 2, bias) + LeakyReLU (fused in the matmul kernel)
    (y,), shp = conv2d(x, params["w0"], params["b0"], 2,
                       apply_lrelu=True, with_stats=False)
    x = y.reshape(shp)

    # layers 1..n_layers-1: conv(stride 2, no bias) + BN + LeakyReLU
    idx = 1
    for _ in range(1, n_layers):
        (y, s, ss), shp = conv2d(x, params[f"w{idx}"], None, 2,
                                 apply_lrelu=False, with_stats=True)
        y = batchnorm_lrelu(y, s, ss, params[f"gamma{idx}"], params[f"beta{idx}"])
        x = y.reshape(shp)
        idx += 1

    # stride-1 conv (no bias) + BN + LeakyReLU
    (y, s, ss), shp = conv2d(x, params[f"w{idx}"], None, 1,
                             apply_lrelu=False, with_stats=True)
    y = batchnorm_lrelu(y, s, ss, params[f"gamma{idx}"], params[f"beta{idx}"])
    x = y.reshape(shp)
    idx += 1

    # final 1-channel conv (stride 1, bias), no activation
    (y,), shp = conv2d(x, params[f"w{idx}"], params[f"b{idx}"], 1,
                       apply_lrelu=False, with_stats=False)
    out = y.reshape(shp)
    return jnp.transpose(out, (0, 3, 1, 2))  # NHWC -> NCHW


def make_params(key, input_nc, ndf, n_layers):
    """Deterministic synthetic parameters with the exact shapes of the module."""
    params = {}
    keys = jax.random.split(key, 16)
    ki = 0

    def conv_w(cout, cin):
        nonlocal ki
        w = 0.02 * jax.random.normal(keys[ki], (cout, cin, 4, 4), jnp.float32)
        ki += 1
        return w

    def conv_b(cout):
        nonlocal ki
        b = 0.02 * jax.random.normal(keys[ki], (cout,), jnp.float32)
        ki += 1
        return b

    # layer 0
    params["w0"] = conv_w(ndf, input_nc)
    params["b0"] = conv_b(ndf)
    # intermediate stride-2 layers
    nf_mult = 1
    idx = 1
    for i in range(1, n_layers):
        nf_mult_prev = nf_mult
        nf_mult = min(2 ** i, 8)
        params[f"w{idx}"] = conv_w(ndf * nf_mult, ndf * nf_mult_prev)
        params[f"gamma{idx}"] = jnp.ones((ndf * nf_mult,), jnp.float32)
        params[f"beta{idx}"] = jnp.zeros((ndf * nf_mult,), jnp.float32)
        idx += 1
    # stride-1 layer
    nf_mult_prev = nf_mult
    nf_mult = min(2 ** n_layers, 8)
    params[f"w{idx}"] = conv_w(ndf * nf_mult, ndf * nf_mult_prev)
    params[f"gamma{idx}"] = jnp.ones((ndf * nf_mult,), jnp.float32)
    params[f"beta{idx}"] = jnp.zeros((ndf * nf_mult,), jnp.float32)
    idx += 1
    # final conv
    params[f"w{idx}"] = conv_w(1, ndf * nf_mult)
    params[f"b{idx}"] = conv_b(1)
    return params


if __name__ == "__main__":
    # Small but valid config: n_layers=3 downsamples 32 -> 16 -> 8 -> 4,
    # then two stride-1 4x4 convs give 3 -> 2, so output is (N, 1, 2, 2).
    INPUT_NC, NDF, N_LAYERS = 3, 8, 3
    key = jax.random.PRNGKey(0)
    k_x, k_p = jax.random.split(key)
    x = jax.random.normal(k_x, (2, INPUT_NC, 32, 32), jnp.float32)  # NCHW input
    params = make_params(k_p, INPUT_NC, NDF, N_LAYERS)

    out = n_layer_discriminator_forward(x, params, n_layers=N_LAYERS)
    out = jax.block_until_ready(out)
    assert out.shape == (2, 1, 2, 2), out.shape
    assert bool(jnp.all(jnp.isfinite(out)))
    print("KERNEL_OK")
</pallas_src>

<mosaic_0001>
module attributes {stable_mosaic.version = 11 : i64} {
  func.func @_conv_mm_kernel(%arg0: i32, %arg1: i32, %arg2: memref<256x48xbf16, #tpu.memory_space<vmem>>, %arg3: memref<48x8xbf16, #tpu.memory_space<vmem>>, %arg4: memref<1x8xf32, #tpu.memory_space<vmem>>, %arg5: memref<256x8xf32, #tpu.memory_space<vmem>>, %arg6: memref<256x8xf32, #tpu.memory_space<vmem>>) attributes {dimension_semantics = [#tpu.dimension_semantics<parallel>, #tpu.dimension_semantics<arbitrary>], iteration_bounds = array<i64: 2, 1>, scalar_prefetch = 0 : i64, scratch_operands = 1 : i64, tpu.core_type = #tpu.core_type<tc>, window_params = [{transform_indices = @transform_0, window_bounds = array<i64: 256, 48>}, {transform_indices = @transform_1, window_bounds = array<i64: 48, 8>}, {pipeline_mode = #tpu.pipeline_mode<synchronous>, transform_indices = @transform_2, window_bounds = array<i64: 1, 8>}, {transform_indices = @transform_3, window_bounds = array<i64: 256, 8>}]} {
    %c0_i32 = arith.constant 0 : i32
    %0 = arith.cmpi eq, %arg1, %c0_i32 : i32
    %1 = arith.extui %0 : i1 to i32
    %c0_i32_0 = arith.constant 0 : i32
    %2 = arith.cmpi ne, %1, %c0_i32_0 : i32
    scf.if %2 {
      %cst_10 = arith.constant 0.000000e+00 : f32
      %12 = vector.broadcast %cst_10 : f32 to vector<256x8xf32>
      %c0_11 = arith.constant 0 : index
      %c0_12 = arith.constant 0 : index
      %13 = vector.load %arg6[%c0_11, %c0_12] : memref<256x8xf32, #tpu.memory_space<vmem>>, vector<256x8xf32>
      tpu.vector_store %arg6[%c0_11, %c0_12], %12 {strides = array<i32>} : memref<256x8xf32, #tpu.memory_space<vmem>>, vector<256x8xf32>,
    } else {
    }
    %c0 = arith.constant 0 : index
    %c0_1 = arith.constant 0 : index
    %3 = vector.load %arg6[%c0, %c0_1] : memref<256x8xf32, #tpu.memory_space<vmem>>, vector<256x8xf32>
    %c0_2 = arith.constant 0 : index
    %c0_3 = arith.constant 0 : index
    %4 = vector.load %arg2[%c0_2, %c0_3] : memref<256x48xbf16, #tpu.memory_space<vmem>>, vector<256x48xbf16>
    %c0_4 = arith.constant 0 : index
    %c0_5 = arith.constant 0 : index
    %5 = vector.load %arg3[%c0_4, %c0_5] : memref<48x8xbf16, #tpu.memory_space<vmem>>, vector<48x8xbf16>
    %cst = arith.constant dense<0.000000e+00> : vector<256x8xf32>
    %6 = tpu.matmul %4, %5, %cst {dimension_numbers = #tpu.dot_dimension_numbers<[1], [0], [0], [1], [0, 0, 1, 1], [], []>} : vector<256x48xbf16>, vector<48x8xbf16>, vector<256x8xf32> -> vector<256x8xf32>
    %7 = arith.addf %3, %6 : vector<256x8xf32>
    %c0_6 = arith.constant 0 : index
    %c0_7 = arith.constant 0 : index
    %8 = vector.load %arg6[%c0_6, %c0_7] : memref<256x8xf32, #tpu.memory_space<vmem>>, vector<256x8xf32>
    tpu.vector_store %arg6[%c0_6, %c0_7], %7 {strides = array<i32>} : memref<256x8xf32, #tpu.memory_space<vmem>>, vector<256x8xf32>,
    %c0_i32_8 = arith.constant 0 : i32
    %9 = arith.cmpi eq, %arg1, %c0_i32_8 : i32
    %10 = arith.extui %9 : i1 to i32
    %c0_i32_9 = arith.constant 0 : i32
    %11 = arith.cmpi ne, %10, %c0_i32_9 : i32
    scf.if %11 {
      %c0_10 = arith.constant 0 : index
      %c0_11 = arith.constant 0 : index
      %12 = vector.load %arg6[%c0_10, %c0_11] : memref<256x8xf32, #tpu.memory_space<vmem>>, vector<256x8xf32>
      %c0_12 = arith.constant 0 : index
      %c0_13 = arith.constant 0 : index
      %13 = vector.load %arg4[%c0_12, %c0_13] : memref<1x8xf32, #tpu.memory_space<vmem>>, vector<1x8xf32>
      %14 = vector.broadcast %13 : vector<1x8xf32> to vector<256x8xf32>
      %15 = arith.addf %12, %14 : vector<256x8xf32>
      %cst_14 = arith.constant 0.000000e+00 : f32
      %16 = vector.broadcast %cst_14 : f32 to vector<256x8xf32>
      %17 = arith.cmpf ogt, %15, %16 : vector<256x8xf32>
      %cst_15 = arith.constant 2.000000e-01 : f32
      %18 = vector.broadcast %cst_15 : f32 to vector<256x8xf32>
      %19 = arith.mulf %18, %15 : vector<256x8xf32>
      %20 = arith.select %17, %15, %19 : vector<256x8xi1>, vector<256x8xf32>
      %c0_16 = arith.constant 0 : index
      %c0_17 = arith.constant 0 : index
      %21 = vector.load %arg5[%c0_16, %c0_17] : memref<256x8xf32, #tpu.memory_space<vmem>>, vector<256x8xf32>
      tpu.vector_store %arg5[%c0_16, %c0_17], %20 {strides = array<i32>} : memref<256x8xf32, #tpu.memory_space<vmem>>, vector<256x8xf32>,
    } else {
    }
    return
  }
  func.func @transform_0(%arg0: i32, %arg1: i32) -> (i32, i32) {
    %c0_i32 = arith.constant 0 : i32
    return %arg0, %arg1 : i32, i32
  }
  func.func @transform_1(%arg0: i32, %arg1: i32) -> (i32, i32) {
    %c0_i32 = arith.constant 0 : i32
    %c0_i32_0 = arith.constant 0 : i32
    return %arg1, %c0_i32 : i32, i32
  }
  func.func @transform_2(%arg0: i32, %arg1: i32) -> (i32, i32) {
    %c0_i32 = arith.constant 0 : i32
    %c0_i32_0 = arith.constant 0 : i32
    %c0_i32_1 = arith.constant 0 : i32
    return %c0_i32, %c0_i32_0 : i32, i32
  }
  func.func @transform_3(%arg0: i32, %arg1: i32) -> (i32, i32) {
    %c0_i32 = arith.constant 0 : i32
    %c0_i32_0 = arith.constant 0 : i32
    return %arg0, %c0_i32 : i32, i32
  }
}

</mosaic_0001>

<bundles_post_ra>
// kernel: tpu_custom_call.1
= control target key start
LH: loop header
LB: loop body
LE: loop exit
PB: predicated region body
PF: predicated region fallthrough
CT: control target
= control target key end

     0   :  { %s1185_s12 = smov 0   ;;  %s1187_s13 = smov 0   ;;  %s1448_s0 = inlined_call_operand.vmem [shape: bf16[512,48], index: 0, kind: input, shape index: {}]   ;;  %s1449_s1 = inlined_call_operand.vmem [shape: bf16[48,8], index: 1, kind: input, shape index: {}]   ;;  %s1450_s2 = inlined_call_operand.vmem [shape: f32[1,8], index: 2, kind: input, shape index: {}]   ;;  %s1451_s3 = inlined_call_operand.vmem [shape: f32[512,8], index: 3, kind: output, shape index: {}]  }
   0x1   :  { %s1189_s14 = smov 0  }
   0x2 LB: > { %s25_s15 = sadd.s32 1, %s1158_s13  ;;  %p990_p0 = scmp.ge.s32.totalorder %s1162_s14, 1  ;;  %s1162_s14 = sphi %s1189_s14, %s13_s14   ;;  %s1158_s13 = sphi %s1187_s13, %s1453_s13   ;;  %s1154_s12 = sphi %s1185_s12, %s1452_s12  }
   0x3   : > { %p27_p1 = scmp.ge.s32.totalorder %s25_s15, 2  ;;  %p166_p2 = scmp.lt.s32.totalorder %s1162_s14, 3 }
   0x5   : > { %s1455_s15 = smov (%p27_p1, %s25_s15), 0  ;;  %p167_p3 = pnand %p990_p0, %p166_p2 }
   0x6   : > { %s991_s18 = sshll.u32 (!%p167_p3), %s1154_s12, 5 }
   0x7   : > { %170 = sbr.rel (%p167_p3) target bundleno = 275 (0x113), region = 32  ;;  %p199_p4 = scmp.lt.s32.totalorder (!%p167_p3), %s991_s18, 63 }
   0xc   : > { %v1121_v0 = vld [vmem:[%s1449_s1 + $0x10] sm:$0xff]   ;;  %v1122_v1 = vld [vmem:[%s1449_s1 + $0x8] sm:$0xff]   ;;  %s1457_s18 = smov (!%p199_p4, %s991_s18), 63  ;;  %vm224_vm0 = vcmask 64512   ;;  %v1123_v2 = vld [vmem:[%s1449_s1] sm:$0xff]   ;;  %v1164_v3 = vmov 0.0  }
   0xd   : > { %1052 = vmatprep.subr.bf16.mxu0 %v1121_v0  ;;  %1090 = vmatprep.subr.bf16.mxu1 %v1121_v0  ;;  %227 = vst.msk [vmem:[#allocation2 + $0x10] sm:$0xff] %vm224_vm0, %v1164_v3  ;;  %225 = vst.msk [vmem:[#allocation2] sm:$0xff] %vm224_vm0, %v1164_v3  ;;  %s992_s23 = sshll.u32 %s1457_s18, 2  ;;  %vm425_vm1 = vcmask 392192   ;;  %v1293_v46 = vld [vmem:[%s1450_s2] ss:$0 sm:$0xff] }
   0xe   : > { %1053 = vmatpush3.bf16.msra.mxu0 %v1121_v0  ;;  %1093 = vmatpush3.bf16.msra.mxu1 %v1121_v0  ;;  %226 = vst.msk [vmem:[#allocation2 + $0x8] sm:$0xff] %vm224_vm0, %v1164_v3  ;;  %228 = vst.msk [vmem:[#allocation2 + $0x18] sm:$0xff] %vm224_vm0, %v1164_v3  ;;  %s1250_s26 = scalar_lea.vmem %s1448_s0, %s992_s23  ;;  %s994_s29 = sshll.u32 %s1457_s18, 3 }
   0xf   : > { %1054 = vmatprep.subr.bf16.mxu0 %v1122_v1  ;;  %1091 = vmatprep.subr.bf16.mxu1 %v1122_v1  ;;  %229 = vst.msk [vmem:[#allocation2 + $0x20] sm:$0xff] %vm224_vm0, %v1164_v3  ;;  %230 = vst.msk [vmem:[#allocation2 + $0x28] sm:$0xff] %vm224_vm0, %v1164_v3  ;;  %v1124_v4 = vld [vmem:[%s1250_s26] sm:$0xff]   ;;  %v1126_v6 = vld [vmem:[%s1250_s26 + $0x8] sm:$0xff]   ;;  %s1305_s5 = scalar_lea.vmem %s1451_s3, %s994_s29 }
  0x10   : > { %231 = vst.msk [vmem:[#allocation2 + $0x30] sm:$0xff] %vm224_vm0, %v1164_v3  ;;  %232 = vst.msk [vmem:[#allocation2 + $0x38] sm:$0xff] %vm224_vm0, %v1164_v3  ;;  %v1125_v5 = vld [vmem:[%s1250_s26 + $0x40] sm:$0xff]   ;;  %1058 = vmatprep.mubr.msk.bf16.mxu0 %vm425_vm1, %v1124_v4  ;;  %v1127_v7 = vld [vmem:[%s1250_s26 + $0x48] sm:$0xff]  }
  0x11   : > { %233 = vst.msk [vmem:[#allocation2 + $0x40] sm:$0xff] %vm224_vm0, %v1164_v3  ;;  %234 = vst.msk [vmem:[#allocation2 + $0x48] sm:$0xff] %vm224_vm0, %v1164_v3  ;;  %1074 = vmatprep.mubr.msk.bf16.mxu1 %vm425_vm1, %v1125_v5  ;;  %v1128_v8 = vld [vmem:[%s1250_s26 + $0x10] sm:$0xff]   ;;  %v1130_v10 = vld [vmem:[%s1250_s26 + $0x18] sm:$0xff]  }
  0x12   : > { %235 = vst.msk [vmem:[#allocation2 + $0x50] sm:$0xff] %vm224_vm0, %v1164_v3  ;;  %236 = vst.msk [vmem:[#allocation2 + $0x58] sm:$0xff] %vm224_vm0, %v1164_v3  ;;  %1055 = vmatpush3.bf16.msra.mxu0 %v1122_v1  ;;  %1094 = vmatpush3.bf16.msra.mxu1 %v1122_v1  ;;  %v1129_v9 = vld [vmem:[%s1250_s26 + $0x50] sm:$0xff]   ;;  %v1131_v11 = vld [vmem:[%s1250_s26 + $0x58] sm:$0xff]  }
  0x13   : > { %237 = vst.msk [vmem:[#allocation2 + $0x60] sm:$0xff] %vm224_vm0, %v1164_v3  ;;  %238 = vst.msk [vmem:[#allocation2 + $0x68] sm:$0xff] %vm224_vm0, %v1164_v3  ;;  %1056 = vmatprep.subr.bf16.mxu0 %v1123_v2  ;;  %1092 = vmatprep.subr.bf16.mxu1 %v1123_v2  ;;  %v1132_v12 = vld [vmem:[%s1250_s26 + $0x20] sm:$0xff]   ;;  %v1134_v14 = vld [vmem:[%s1250_s26 + $0x28] sm:$0xff]  }
  0x14   : > { %239 = vst.msk [vmem:[#allocation2 + $0x70] sm:$0xff] %vm224_vm0, %v1164_v3  ;;  %240 = vst.msk [vmem:[#allocation2 + $0x78] sm:$0xff] %vm224_vm0, %v1164_v3  ;;  %v1133_v13 = vld [vmem:[%s1250_s26 + $0x60] sm:$0xff]   ;;  %v1135_v15 = vld [vmem:[%s1250_s26 + $0x68] sm:$0xff]  }
  0x15   : > { %241 = vst.msk [vmem:[#allocation2 + $0x80] sm:$0xff] %vm224_vm0, %v1164_v3  ;;  %242 = vst.msk [vmem:[#allocation2 + $0x88] sm:$0xff] %vm224_vm0, %v1164_v3  ;;  %v1136_v16 = vld [vmem:[%s1250_s26 + $0x30] sm:$0xff]   ;;  %v1138_v18 = vld [vmem:[%s1250_s26 + $0x38] sm:$0xff]  }
  0x16   : > { %243 = vst.msk [vmem:[#allocation2 + $0x90] sm:$0xff] %vm224_vm0, %v1164_v3  ;;  %244 = vst.msk [vmem:[#allocation2 + $0x98] sm:$0xff] %vm224_vm0, %v1164_v3  ;;  %1057 = vmatpush3.bf16.msra.mxu0 %v1123_v2  ;;  %1095 = vmatpush3.bf16.msra.mxu1 %v1123_v2  ;;  %v1137_v17 = vld [vmem:[%s1250_s26 + $0x70] sm:$0xff]   ;;  %v1139_v19 = vld [vmem:[%s1250_s26 + $0x78] sm:$0xff]  }
  0x17   : > { %245 = vst.msk [vmem:[#allocation2 + $0xa0] sm:$0xff] %vm224_vm0, %v1164_v3  ;;  %246 = vst.msk [vmem:[#allocation2 + $0xa8] sm:$0xff] %vm224_vm0, %v1164_v3  ;;  %v259_v20 = vld [vmem:[#allocation2 + $0x10] sm:$0xff]  ;;  %v257_v24 = vld [vmem:[#allocation2] sm:$0xff] }
  0x18   : > { %247 = vst.msk [vmem:[#allocation2 + $0xb0] sm:$0xff] %vm224_vm0, %v1164_v3  ;;  %248 = vst.msk [vmem:[#allocation2 + $0xb8] sm:$0xff] %vm224_vm0, %v1164_v3  ;;  %v260_v30 = vld [vmem:[#allocation2 + $0x18] sm:$0xff]  ;;  %v258_v36 = vld [vmem:[#allocation2 + $0x8] sm:$0xff] }
  0x19   : > { %249 = vst.msk [vmem:[#allocation2 + $0xc0] sm:$0xff] %vm224_vm0, %v1164_v3  ;;  %250 = vst.msk [vmem:[#allocation2 + $0xc8] sm:$0xff] %vm224_vm0, %v1164_v3  ;;  %1059 = vmatmul.mubr.msk.bf16.vlgmr.msra.gmra.mxu0 %vm425_vm1, %v1126_v6  ;;  %1075 = vmatmul.mubr.msk.bf16.vlgmr.msra.gmra.mxu1 %vm425_vm1, %v1127_v7  ;;  %v263_v42 = vld [vmem:[#allocation2 + $0x30] sm:$0xff]  ;;  %v261_v49 = vld [vmem:[#allocation2 + $0x20] sm:$0xff] }
  0x1a   : > { %251 = vst.msk [vmem:[#allocation2 + $0xd0] sm:$0xff] %vm224_vm0, %v1164_v3  ;;  %252 = vst.msk [vmem:[#allocation2 + $0xd8] sm:$0xff] %vm224_vm0, %v1164_v3  ;;  %1062 = vmatprep.mubr.msk.bf16.mxu0 %vm425_vm1, %v1128_v8  ;;  %1078 = vmatprep.mubr.msk.bf16.mxu1 %vm425_vm1, %v1129_v9  ;;  %v264_v61 = vld [vmem:[#allocation2 + $0x38] sm:$0xff] }
  0x1b   : > { %253 = vst.msk [vmem:[#allocation2 + $0xe0] sm:$0xff] %vm224_vm0, %v1164_v3  ;;  %254 = vst.msk [vmem:[#allocation2 + $0xe8] sm:$0xff] %vm224_vm0, %v1164_v3 }
  0x1c   : > { %255 = vst.msk [vmem:[#allocation2 + $0xf0] sm:$0xff] %vm224_vm0, %v1164_v3  ;;  %256 = vst.msk [vmem:[#allocation2 + $0xf8] sm:$0xff] %vm224_vm0, %v1164_v3  ;;  %v273_v25 = vld [vmem:[#allocation2 + $0x80] sm:$0xff]  ;;  %v274_v37 = vld [vmem:[#allocation2 + $0x88] sm:$0xff] }
  0x1d   : > { %v275_v21 = vld [vmem:[#allocation2 + $0x90] sm:$0xff]  ;;  %v276_v31 = vld [vmem:[#allocation2 + $0x98] sm:$0xff] }
  0x1e   : > { %v277_v50 = vld [vmem:[#allocation2 + $0xa0] sm:$0xff] }
  0x1f   : > { %v279_v43 = vld [vmem:[#allocation2 + $0xb0] sm:$0xff]  ;;  %v280_v62 = vld [vmem:[#allocation2 + $0xb8] sm:$0xff] }
  0x21   : > { %1063 = vmatmul.mubr.msk.bf16.gmra.mxu0 %vm425_vm1, %v1130_v10  ;;  %1079 = vmatmul.mubr.msk.bf16.gmra.mxu1 %vm425_vm1, %v1131_v11  ;;  %v262_v11 = vld [vmem:[#allocation2 + $0x28] sm:$0xff] }
  0x22   : > { %1066 = vmatprep.mubr.msk.bf16.mxu0 %vm425_vm1, %v1132_v12  ;;  %1082 = vmatprep.mubr.msk.bf16.mxu1 %vm425_vm1, %v1133_v13 }
  0x29   : > { %1067 = vmatmul.mubr.msk.bf16.gmra.mxu0 %vm425_vm1, %v1134_v14  ;;  %1083 = vmatmul.mubr.msk.bf16.gmra.mxu1 %vm425_vm1, %v1135_v15 }
  0x2a   : > { %1070 = vmatprep.mubr.msk.bf16.mxu0 %vm425_vm1, %v1136_v16  ;;  %1086 = vmatprep.mubr.msk.bf16.mxu1 %vm425_vm1, %v1137_v17 }
  0x31   : > { %1071 = vmatmul.mubr.msk.bf16.gmra.mxu0 %vm425_vm1, %v1138_v18  ;;  %1087 = vmatmul.mubr.msk.bf16.gmra.mxu1 %vm425_vm1, %v1139_v19  ;;  %v278_v18 = vld [vmem:[#allocation2 + $0xa8] sm:$0xff]  ;;  %v267_v19 = vld [vmem:[#allocation2 + $0x50] sm:$0xff] }
  0xd9   : > { %v1060_v22 = vpop.f32.mrf.mxu0  ;;  %v1076_v23 = vpop.f32.mrf.mxu1 }
  0xda   : > { %v637_v26 = vadd.f32 %v1060_v22, %v259_v20  ;;  %v653_v27 = vadd.f32 %v1076_v23, %v275_v21  ;;  %v283_v20 = vld [vmem:[#allocation2 + $0xd0] sm:$0xff] }
  0xdb   : > { %v508_v28 = vpop.f32.mrf.mxu0  ;;  %v572_v29 = vpop.f32.mrf.mxu1 }
  0xdc   : > { %670 = vst.msk [vmem:[#allocation2 + $0x10] sm:$0xff] %vm224_vm0, %v637_v26  ;;  %686 = vst.msk [vmem:[#allocation2 + $0x90] sm:$0xff] %vm224_vm0, %v653_v27  ;;  %v635_v32 = vadd.f32 %v508_v28, %v257_v24  ;;  %v651_v33 = vadd.f32 %v572_v29, %v273_v25 }
  0xdd   : > { %v1061_v34 = vpop.f32.mrf.mxu0  ;;  %v1077_v35 = vpop.f32.mrf.mxu1 }
  0xde   : > { %668 = vst.msk [vmem:[#allocation2] sm:$0xff] %vm224_vm0, %v635_v32  ;;  %684 = vst.msk [vmem:[#allocation2 + $0x80] sm:$0xff] %vm224_vm0, %v651_v33  ;;  %v638_v38 = vadd.f32 %v1061_v34, %v260_v30  ;;  %v654_v39 = vadd.f32 %v1077_v35, %v276_v31 }
  0xdf   : > { %v511_v40 = vpop.f32.mrf.mxu0  ;;  %v575_v41 = vpop.f32.mrf.mxu1 }
  0xe0   : > { %671 = vst.msk [vmem:[#allocation2 + $0x18] sm:$0xff] %vm224_vm0, %v638_v38  ;;  %687 = vst.msk [vmem:[#allocation2 + $0x98] sm:$0xff] %vm224_vm0, %v654_v39  ;;  %v636_v44 = vadd.f32 %v511_v40, %v258_v36  ;;  %v652_v45 = vadd.f32 %v575_v41, %v274_v37 }
  0xe1   : > { %v1064_v47 = vpop.f32.mrf.mxu0  ;;  %v1080_v48 = vpop.f32.mrf.mxu1 }
  0xe2   : > { %669 = vst.msk [vmem:[#allocation2 + $0x8] sm:$0xff] %vm224_vm0, %v636_v44  ;;  %685 = vst.msk [vmem:[#allocation2 + $0x88] sm:$0xff] %vm224_vm0, %v652_v45  ;;  %v641_v51 = vadd.f32 %v1064_v47, %v263_v42  ;;  %v657_v52 = vadd.f32 %v1080_v48, %v279_v43 }
  0xe3   : > { %v705_v53 = vld [vmem:[#allocation2 + $0x10] sm:$0xff]  ;;  %v524_v55 = vpop.f32.mrf.mxu0  ;;  %v588_v56 = vpop.f32.mrf.mxu1 }
  0xe4   : > { %v721_v54 = vld [vmem:[#allocation2 + $0x90] sm:$0xff]  ;;  %v744_v57 = vadd.f32 %v1293_v46, %v705_v53  ;;  %674 = vst.msk [vmem:[#allocation2 + $0x30] sm:$0xff] %vm224_vm0, %v641_v51  ;;  %690 = vst.msk [vmem:[#allocation2 + $0xb0] sm:$0xff] %vm224_vm0, %v657_v52  ;;  %v639_v59 = vadd.f32 %v524_v55, %v261_v49  ;;  %v655_v60 = vadd.f32 %v588_v56, %v277_v50 }
  0xe5   : > { %v760_v58 = vadd.f32 %v1293_v46, %v721_v54  ;;  %v703_v63 = vld [vmem:[#allocation2] sm:$0xff]  ;;  %v1065_v1 = vpop.f32.mrf.mxu0  ;;  %v1081_v2 = vpop.f32.mrf.mxu1 }
  0xe6   : > { %v719_v0 = vld [vmem:[#allocation2 + $0x80] sm:$0xff]  ;;  %vm776_vm2 = vcmp.gt.f32.partialorder %v744_v57, 0.0  ;;  %v808_v3 = vmul.f32 0.2, %v744_v57  ;;  %672 = vst.msk [vmem:[#allocation2 + $0x20] sm:$0xff] %vm224_vm0, %v639_v59  ;;  %688 = vst.msk [vmem:[#allocation2 + $0xa0] sm:$0xff] %vm224_vm0, %v655_v60  ;;  %v742_v5 = vadd.f32 %v1293_v46, %v703_v63  ;;  %v642_v9 = vadd.f32 %v1065_v1, %v264_v61 }
  0xe7   : > { %vm792_vm3 = vcmp.gt.f32.partialorder %v760_v58, 0.0  ;;  %v824_v4 = vmul.f32 0.2, %v760_v58  ;;  %v758_v6 = vadd.f32 %v1293_v46, %v719_v0  ;;  %v706_v7 = vld [vmem:[#allocation2 + $0x18] sm:$0xff]  ;;  %v658_v10 = vadd.f32 %v1081_v2, %v280_v62  ;;  %v527_v12 = vpop.f32.mrf.mxu0  ;;  %v591_v13 = vpop.f32.mrf.mxu1  ;;  %v265_v54 = vld [vmem:[#allocation2 + $0x40] sm:$0xff] }
  0xe8   : > { %v722_v8 = vld [vmem:[#allocation2 + $0x98] sm:$0xff]  ;;  %v840_v14 = vsel %vm776_vm2, %v744_v57, %v808_v3  ;;  %v745_v16 = vadd.f32 %v1293_v46, %v706_v7  ;;  %vm774_vm4 = vcmp.gt.f32.partialorder %v742_v5, 0.0  ;;  %v806_v21 = vmul.f32 0.2, %v742_v5  ;;  %675 = vst.msk [vmem:[#allocation2 + $0x38] sm:$0xff] %vm224_vm0, %v642_v9  ;;  %v281_v63 = vld [vmem:[#allocation2 + $0xc0] sm:$0xff] }
  0xe9   : > { %v856_v15 = vsel %vm792_vm3, %v760_v58, %v824_v4  ;;  %v761_v17 = vadd.f32 %v1293_v46, %v722_v8  ;;  %872 = vst.msk [vmem:[%s1305_s5 + $0x10] sm:$0xff] %vm224_vm0, %v840_v14  ;;  %vm790_vm5 = vcmp.gt.f32.partialorder %v758_v6, 0.0  ;;  %v822_v22 = vmul.f32 0.2, %v758_v6  ;;  %691 = vst.msk [vmem:[#allocation2 + $0xb8] sm:$0xff] %vm224_vm0, %v658_v10  ;;  %v1068_v23 = vpop.f32.mrf.mxu0  ;;  %v1084_v24 = vpop.f32.mrf.mxu1  ;;  %v704_v29 = vld [vmem:[#allocation2 + $0x8] sm:$0xff] }
  0xea   : > { %888 = vst.msk [vmem:[%s1305_s5 + $0x90] sm:$0xff] %vm224_vm0, %v856_v15  ;;  %vm777_vm6 = vcmp.gt.f32.partialorder %v745_v16, 0.0  ;;  %v809_v25 = vmul.f32 0.2, %v745_v16  ;;  %v838_v27 = vsel %vm774_vm4, %v742_v5, %v806_v21  ;;  %v720_v30 = vld [vmem:[#allocation2 + $0x88] sm:$0xff]  ;;  %v640_v32 = vadd.f32 %v527_v12, %v262_v11  ;;  %v268_v4 = vld [vmem:[#allocation2 + $0x58] sm:$0xff] }
  0xeb   : > { %vm793_vm7 = vcmp.gt.f32.partialorder %v761_v17, 0.0  ;;  %v825_v26 = vmul.f32 0.2, %v761_v17  ;;  %v854_v28 = vsel %vm790_vm5, %v758_v6, %v822_v22  ;;  %v709_v31 = vld [vmem:[#allocation2 + $0x30] sm:$0xff]  ;;  %v656_v33 = vadd.f32 %v591_v13, %v278_v18  ;;  %v1319_v34 = vpop.f32.mrf.mxu0  ;;  %v1321_v35 = vpop.f32.mrf.mxu1  ;;  %870 = vst.msk [vmem:[%s1305_s5] sm:$0xff] %vm224_vm0, %v838_v27  ;;  %v284_v5 = vld [vmem:[#allocation2 + $0xd8] sm:$0xff] }
  0xec   : > { %886 = vst.msk [vmem:[%s1305_s5 + $0x80] sm:$0xff] %vm224_vm0, %v854_v28  ;;  %v841_v36 = vsel %vm777_vm6, %v745_v16, %v809_v25  ;;  %v743_v38 = vadd.f32 %v1293_v46, %v704_v29  ;;  %v759_v39 = vadd.f32 %v1293_v46, %v720_v30  ;;  %v725_v40 = vld [vmem:[#allocation2 + $0xb0] sm:$0xff]  ;;  %v748_v41 = vadd.f32 %v1293_v46, %v709_v31  ;;  %v266_v6 = vld [vmem:[#allocation2 + $0x48] sm:$0xff]  ;;  %v269_v28 = vld [vmem:[#allocation2 + $0x60] sm:$0xff] }
  0xed   : > { %v857_v37 = vsel %vm793_vm7, %v761_v17, %v825_v26  ;;  %873 = vst.msk [vmem:[%s1305_s5 + $0x18] sm:$0xff] %vm224_vm0, %v841_v36  ;;  %v764_v42 = vadd.f32 %v1293_v46, %v725_v40  ;;  %v707_v43 = vld [vmem:[#allocation2 + $0x20] sm:$0xff]  ;;  %673 = vst.msk [vmem:[#allocation2 + $0x28] sm:$0xff] %vm224_vm0, %v640_v32  ;;  %v645_v45 = vadd.f32 %v1068_v23, %v267_v19  ;;  %v1337_v48 = vpop.f32.mrf.mxu0  ;;  %v1339_v49 = vpop.f32.mrf.mxu1  ;;  %v282_v7 = vld [vmem:[#allocation2 + $0xc8] sm:$0xff] }
  0xee   : > { %889 = vst.msk [vmem:[%s1305_s5 + $0x98] sm:$0xff] %vm224_vm0, %v857_v37  ;;  %v723_v44 = vld [vmem:[#allocation2 + $0xa0] sm:$0xff]  ;;  %689 = vst.msk [vmem:[#allocation2 + $0xa8] sm:$0xff] %vm224_vm0, %v656_v33  ;;  %v661_v47 = vadd.f32 %v1084_v24, %v283_v20  ;;  %vm775_vm8 = vcmp.gt.f32.partialorder %v743_v38, 0.0  ;;  %v807_v50 = vmul.f32 0.2, %v743_v38  ;;  %v746_v59 = vadd.f32 %v1293_v46, %v707_v43 }
  0xef   : > { %vm791_vm9 = vcmp.gt.f32.partialorder %v759_v39, 0.0  ;;  %v823_v51 = vmul.f32 0.2, %v759_v39  ;;  %vm780_vm10 = vcmp.gt.f32.partialorder %v748_v41, 0.0  ;;  %v812_v52 = vmul.f32 0.2, %v748_v41  ;;  %v543_v55 = vpop.f32.mrf.mxu0  ;;  %v607_v56 = vpop.f32.mrf.mxu1 }
  0xf0   : > { %vm796_vm11 = vcmp.gt.f32.partialorder %v764_v42, 0.0  ;;  %v828_v53 = vmul.f32 0.2, %v764_v42  ;;  %678 = vst.msk [vmem:[#allocation2 + $0x50] sm:$0xff] %vm224_vm0, %v645_v45  ;;  %694 = vst.msk [vmem:[#allocation2 + $0xd0] sm:$0xff] %vm224_vm0, %v661_v47  ;;  %v839_v57 = vsel %vm775_vm8, %v743_v38, %v807_v50  ;;  %v762_v60 = vadd.f32 %v1293_v46, %v723_v44  ;;  %v710_v61 = vld [vmem:[#allocation2 + $0x38] sm:$0xff] }
  0xf1   : > { %v855_v58 = vsel %vm791_vm9, %v759_v39, %v823_v51  ;;  %v726_v62 = vld [vmem:[#allocation2 + $0xb8] sm:$0xff]  ;;  %871 = vst.msk [vmem:[%s1305_s5 + $0x8] sm:$0xff] %vm224_vm0, %v839_v57  ;;  %v844_v0 = vsel %vm780_vm10, %v748_v41, %v812_v52  ;;  %v749_v2 = vadd.f32 %v1293_v46, %v710_v61  ;;  %v1072_v8 = vpop.f32.mrf.mxu0  ;;  %v1088_v9 = vpop.f32.mrf.mxu1  ;;  %vm778_vm12 = vcmp.gt.f32.partialorder %v746_v59, 0.0  ;;  %v271_v22 = vld [vmem:[#allocation2 + $0x70] sm:$0xff]  ;;  %v285_v29 = vld [vmem:[#allocation2 + $0xe0] sm:$0xff] }
  0xf2   : > { %887 = vst.msk [vmem:[%s1305_s5 + $0x88] sm:$0xff] %vm224_vm0, %v855_v58  ;;  %v860_v1 = vsel %vm796_vm11, %v764_v42, %v828_v53  ;;  %v765_v3 = vadd.f32 %v1293_v46, %v726_v62  ;;  %876 = vst.msk [vmem:[%s1305_s5 + $0x30] sm:$0xff] %vm224_vm0, %v844_v0  ;;  %v810_v10 = vmul.f32 0.2, %v746_v59  ;;  %vm794_vm13 = vcmp.gt.f32.partialorder %v762_v60, 0.0  ;;  %v287_v27 = vld [vmem:[#allocation2 + $0xf0] sm:$0xff] }
  0xf3   : > { %892 = vst.msk [vmem:[%s1305_s5 + $0xb0] sm:$0xff] %vm224_vm0, %v860_v1  ;;  %v826_v11 = vmul.f32 0.2, %v762_v60  ;;  %vm781_vm14 = vcmp.gt.f32.partialorder %v749_v2, 0.0  ;;  %v813_v12 = vmul.f32 0.2, %v749_v2  ;;  %v556_v14 = vpop.f32.mrf.mxu0  ;;  %v620_v15 = vpop.f32.mrf.mxu1  ;;  %v643_v20 = vadd.f32 %v1319_v34, %v265_v54 }
  0xf4   : > { %vm797_vm15 = vcmp.gt.f32.partialorder %v765_v3, 0.0  ;;  %v829_v13 = vmul.f32 0.2, %v765_v3  ;;  %v842_v16 = vsel %vm778_vm12, %v746_v59, %v810_v10  ;;  %v708_v18 = vld [vmem:[#allocation2 + $0x28] sm:$0xff]  ;;  %v659_v21 = vadd.f32 %v1321_v35, %v281_v63  ;;  %v272_v38 = vld [vmem:[#allocation2 + $0x78] sm:$0xff] }
  0xf5   : > { %v858_v17 = vsel %vm794_vm13, %v762_v60, %v826_v11  ;;  %v724_v19 = vld [vmem:[#allocation2 + $0xa8] sm:$0xff]  ;;  %874 = vst.msk [vmem:[%s1305_s5 + $0x20] sm:$0xff] %vm224_vm0, %v842_v16  ;;  %v845_v23 = vsel %vm781_vm14, %v749_v2, %v813_v12  ;;  %v747_v25 = vadd.f32 %v1293_v46, %v708_v18  ;;  %v1073_v30 = vpop.f32.mrf.mxu0  ;;  %v1089_v31 = vpop.f32.mrf.mxu1  ;;  %676 = vst.msk [vmem:[#allocation2 + $0x40] sm:$0xff] %vm224_vm0, %v643_v20  ;;  %v288_v45 = vld [vmem:[#allocation2 + $0xf8] sm:$0xff] }
  0xf6   : > { %890 = vst.msk [vmem:[%s1305_s5 + $0xa0] sm:$0xff] %vm224_vm0, %v858_v17  ;;  %v861_v24 = vsel %vm797_vm15, %v765_v3, %v829_v13  ;;  %v763_v26 = vadd.f32 %v1293_v46, %v724_v19  ;;  %877 = vst.msk [vmem:[%s1305_s5 + $0x38] sm:$0xff] %vm224_vm0, %v845_v23  ;;  %v646_v34 = vadd.f32 %v1337_v48, %v268_v4  ;;  %v270_v47 = vld [vmem:[#allocation2 + $0x68] sm:$0xff] }
  0xf7   : > { %893 = vst.msk [vmem:[%s1305_s5 + $0xb8] sm:$0xff] %vm224_vm0, %v861_v24  ;;  %v713_v32 = vld [vmem:[#allocation2 + $0x50] sm:$0xff]  ;;  %692 = vst.msk [vmem:[#allocation2 + $0xc0] sm:$0xff] %vm224_vm0, %v659_v21  ;;  %v662_v35 = vadd.f32 %v1339_v49, %v284_v5  ;;  %v644_v36 = vadd.f32 %v543_v55, %v266_v6  ;;  %v660_v37 = vadd.f32 %v607_v56, %v282_v7  ;;  %vm779_vm1 = vcmp.gt.f32.partialorder %v747_v25, 0.0  ;;  %v559_v48 = vpop.f32.mrf.mxu0  ;;  %v286_v49 = vld [vmem:[#allocation2 + $0xe8] sm:$0xff]  ;;  %v623_v50 = vpop.f32.mrf.mxu1 }
  0xf8   : > { %v729_v33 = vld [vmem:[#allocation2 + $0xd0] sm:$0xff]  ;;  %v811_v39 = vmul.f32 0.2, %v747_v25  ;;  %vm795_vm2 = vcmp.gt.f32.partialorder %v763_v26, 0.0  ;;  %v827_v40 = vmul.f32 0.2, %v763_v26  ;;  %v752_v41 = vadd.f32 %v1293_v46, %v713_v32 }
  0xf9   : > { %v768_v42 = vadd.f32 %v1293_v46, %v729_v33  ;;  %679 = vst.msk [vmem:[#allocation2 + $0x58] sm:$0xff] %vm224_vm0, %v646_v34  ;;  %695 = vst.msk [vmem:[#allocation2 + $0xd8] sm:$0xff] %vm224_vm0, %v662_v35  ;;  %v649_v43 = vadd.f32 %v1072_v8, %v271_v22  ;;  %v665_v44 = vadd.f32 %v1088_v9, %v287_v27 }
  0xfa   : > { %677 = vst.msk [vmem:[#allocation2 + $0x48] sm:$0xff] %vm224_vm0, %v644_v36  ;;  %693 = vst.msk [vmem:[#allocation2 + $0xc8] sm:$0xff] %vm224_vm0, %v660_v37  ;;  %v843_v51 = vsel %vm779_vm1, %v747_v25, %v811_v39  ;;  %v859_v52 = vsel %vm795_vm2, %v763_v26, %v827_v40  ;;  %v647_v53 = vadd.f32 %v556_v14, %v269_v28  ;;  %vm784_vm3 = vcmp.gt.f32.partialorder %v752_v41, 0.0 }
  0xfb   : > { %v663_v54 = vadd.f32 %v620_v15, %v285_v29  ;;  %875 = vst.msk [vmem:[%s1305_s5 + $0x28] sm:$0xff] %vm224_vm0, %v843_v51  ;;  %891 = vst.msk [vmem:[%s1305_s5 + $0xa8] sm:$0xff] %vm224_vm0, %v859_v52  ;;  %v816_v55 = vmul.f32 0.2, %v752_v41  ;;  %vm800_vm4 = vcmp.gt.f32.partialorder %v768_v42, 0.0  ;;  %v650_v57 = vadd.f32 %v1073_v30, %v272_v38 }
  0xfc   : > { %v832_v56 = vmul.f32 0.2, %v768_v42  ;;  %682 = vst.msk [vmem:[#allocation2 + $0x70] sm:$0xff] %vm224_vm0, %v649_v43  ;;  %698 = vst.msk [vmem:[#allocation2 + $0xf0] sm:$0xff] %vm224_vm0, %v665_v44  ;;  %v666_v58 = vadd.f32 %v1089_v31, %v288_v45  ;;  %v648_v59 = vadd.f32 %v559_v48, %v270_v47  ;;  %v664_v60 = vadd.f32 %v623_v50, %v286_v49  ;;  %v711_v63 = vld [vmem:[#allocation2 + $0x40] sm:$0xff] }
  0xfd   : > { %680 = vst.msk [vmem:[#allocation2 + $0x60] sm:$0xff] %vm224_vm0, %v647_v53  ;;  %696 = vst.msk [vmem:[#allocation2 + $0xe0] sm:$0xff] %vm224_vm0, %v663_v54  ;;  %v848_v61 = vsel %vm784_vm3, %v752_v41, %v816_v55  ;;  %v750_v1 = vadd.f32 %v1293_v46, %v711_v63 }
  0xfe   : > { %v864_v62 = vsel %vm800_vm4, %v768_v42, %v832_v56  ;;  %880 = vst.msk [vmem:[%s1305_s5 + $0x50] sm:$0xff] %vm224_vm0, %v848_v61  ;;  %v727_v0 = vld [vmem:[#allocation2 + $0xc0] sm:$0xff]  ;;  %683 = vst.msk [vmem:[#allocation2 + $0x78] sm:$0xff] %vm224_vm0, %v650_v57 }
  0xff   : > { %896 = vst.msk [vmem:[%s1305_s5 + $0xd0] sm:$0xff] %vm224_vm0, %v864_v62  ;;  %699 = vst.msk [vmem:[#allocation2 + $0xf8] sm:$0xff] %vm224_vm0, %v666_v58  ;;  %v766_v2 = vadd.f32 %v1293_v46, %v727_v0  ;;  %vm782_vm5 = vcmp.gt.f32.partialorder %v750_v1, 0.0  ;;  %v814_v6 = vmul.f32 0.2, %v750_v1 }
 0x100   : > { %681 = vst.msk [vmem:[#allocation2 + $0x68] sm:$0xff] %vm224_vm0, %v648_v59  ;;  %697 = vst.msk [vmem:[#allocation2 + $0xe8] sm:$0xff] %vm224_vm0, %v664_v60  ;;  %v714_v3 = vld [vmem:[#allocation2 + $0x58] sm:$0xff] }
 0x101   : > { %v730_v4 = vld [vmem:[#allocation2 + $0xd8] sm:$0xff]  ;;  %v712_v5 = vld [vmem:[#allocation2 + $0x48] sm:$0xff]  ;;  %vm798_vm6 = vcmp.gt.f32.partialorder %v766_v2, 0.0  ;;  %v830_v7 = vmul.f32 0.2, %v766_v2  ;;  %v753_v8 = vadd.f32 %v1293_v46, %v714_v3  ;;  %v846_v13 = vsel %vm782_vm5, %v750_v1, %v814_v6 }
 0x102   : > { %v769_v9 = vadd.f32 %v1293_v46, %v730_v4  ;;  %v751_v10 = vadd.f32 %v1293_v46, %v712_v5  ;;  %v728_v11 = vld [vmem:[#allocation2 + $0xc8] sm:$0xff]  ;;  %878 = vst.msk [vmem:[%s1305_s5 + $0x40] sm:$0xff] %vm224_vm0, %v846_v13 }
 0x103   : > { %v717_v12 = vld [vmem:[#allocation2 + $0x70] sm:$0xff]  ;;  %v862_v14 = vsel %vm798_vm6, %v766_v2, %v830_v7  ;;  %v767_v15 = vadd.f32 %v1293_v46, %v728_v11  ;;  %vm785_vm7 = vcmp.gt.f32.partialorder %v753_v8, 0.0  ;;  %v817_v20 = vmul.f32 0.2, %v753_v8 }
 0x104   : > { %v756_v16 = vadd.f32 %v1293_v46, %v717_v12  ;;  %v733_v17 = vld [vmem:[#allocation2 + $0xf0] sm:$0xff]  ;;  %v715_v18 = vld [vmem:[#allocation2 + $0x60] sm:$0xff]  ;;  %894 = vst.msk [vmem:[%s1305_s5 + $0xc0] sm:$0xff] %vm224_vm0, %v862_v14  ;;  %vm801_vm8 = vcmp.gt.f32.partialorder %v769_v9, 0.0  ;;  %v833_v21 = vmul.f32 0.2, %v769_v9 }
 0x105   : > { %v731_v19 = vld [vmem:[#allocation2 + $0xe0] sm:$0xff]  ;;  %vm783_vm9 = vcmp.gt.f32.partialorder %v751_v10, 0.0  ;;  %v815_v22 = vmul.f32 0.2, %v751_v10  ;;  %vm799_vm10 = vcmp.gt.f32.partialorder %v767_v15, 0.0  ;;  %v849_v24 = vsel %vm785_vm7, %v753_v8, %v817_v20  ;;  %v718_v27 = vld [vmem:[#allocation2 + $0x78] sm:$0xff] }
 0x106   : > { %v831_v23 = vmul.f32 0.2, %v767_v15  ;;  %v865_v25 = vsel %vm801_vm8, %v769_v9, %v833_v21  ;;  %vm788_vm11 = vcmp.gt.f32.partialorder %v756_v16, 0.0  ;;  %v820_v26 = vmul.f32 0.2, %v756_v16  ;;  %v734_v28 = vld [vmem:[#allocation2 + $0xf8] sm:$0xff] }
 0x107   : > { %881 = vst.msk [vmem:[%s1305_s5 + $0x58] sm:$0xff] %vm224_vm0, %v849_v24  ;;  %897 = vst.msk [vmem:[%s1305_s5 + $0xd8] sm:$0xff] %vm224_vm0, %v865_v25  ;;  %v847_v29 = vsel %vm783_vm9, %v751_v10, %v815_v22  ;;  %v772_v31 = vadd.f32 %v1293_v46, %v733_v17  ;;  %v754_v32 = vadd.f32 %v1293_v46, %v715_v18  ;;  %v716_v37 = vld [vmem:[#allocation2 + $0x68] sm:$0xff] }
 0x108   : > { %v863_v30 = vsel %vm799_vm10, %v767_v15, %v831_v23  ;;  %879 = vst.msk [vmem:[%s1305_s5 + $0x48] sm:$0xff] %vm224_vm0, %v847_v29  ;;  %v852_v33 = vsel %vm788_vm11, %v756_v16, %v820_v26  ;;  %v770_v34 = vadd.f32 %v1293_v46, %v731_v19  ;;  %v757_v35 = vadd.f32 %v1293_v46, %v718_v27  ;;  %v732_v38 = vld [vmem:[#allocation2 + $0xe8] sm:$0xff] }
 0x109   : > { %895 = vst.msk [vmem:[%s1305_s5 + $0xc8] sm:$0xff] %vm224_vm0, %v863_v30  ;;  %v773_v36 = vadd.f32 %v1293_v46, %v734_v28  ;;  %884 = vst.msk [vmem:[%s1305_s5 + $0x70] sm:$0xff] %vm224_vm0, %v852_v33  ;;  %vm804_vm12 = vcmp.gt.f32.partialorder %v772_v31, 0.0  ;;  %v836_v39 = vmul.f32 0.2, %v772_v31  ;;  %vm786_vm13 = vcmp.gt.f32.partialorder %v754_v32, 0.0 }
 0x10a   : > { %v818_v40 = vmul.f32 0.2, %v754_v32  ;;  %vm802_vm14 = vcmp.gt.f32.partialorder %v770_v34, 0.0  ;;  %v834_v41 = vmul.f32 0.2, %v770_v34  ;;  %vm789_vm15 = vcmp.gt.f32.partialorder %v757_v35, 0.0 }
 0x10b   : > { %v821_v42 = vmul.f32 0.2, %v757_v35  ;;  %v868_v43 = vsel %vm804_vm12, %v772_v31, %v836_v39  ;;  %vm805_vm1 = vcmp.gt.f32.partialorder %v773_v36, 0.0  ;;  %v837_v45 = vmul.f32 0.2, %v773_v36 }
 0x10c   : > { %v850_v44 = vsel %vm786_vm13, %v754_v32, %v818_v40  ;;  %900 = vst.msk [vmem:[%s1305_s5 + $0xf0] sm:$0xff] %vm224_vm0, %v868_v43  ;;  %v866_v47 = vsel %vm802_vm14, %v770_v34, %v834_v41  ;;  %v755_v49 = vadd.f32 %v1293_v46, %v716_v37  ;;  %v771_v50 = vadd.f32 %v1293_v46, %v732_v38 }
 0x10d   : > { %882 = vst.msk [vmem:[%s1305_s5 + $0x60] sm:$0xff] %vm224_vm0, %v850_v44  ;;  %v853_v48 = vsel %vm789_vm15, %v757_v35, %v821_v42  ;;  %898 = vst.msk [vmem:[%s1305_s5 + $0xe0] sm:$0xff] %vm224_vm0, %v866_v47  ;;  %v869_v51 = vsel %vm805_vm1, %v773_v36, %v837_v45 }
 0x10e   : > { %885 = vst.msk [vmem:[%s1305_s5 + $0x78] sm:$0xff] %vm224_vm0, %v853_v48  ;;  %901 = vst.msk [vmem:[%s1305_s5 + $0xf8] sm:$0xff] %vm224_vm0, %v869_v51  ;;  %vm787_vm2 = vcmp.gt.f32.partialorder %v755_v49, 0.0  ;;  %v819_v52 = vmul.f32 0.2, %v755_v49  ;;  %vm803_vm3 = vcmp.gt.f32.partialorder %v771_v50, 0.0 }
 0x10f   : > { %v835_v53 = vmul.f32 0.2, %v771_v50 }
 0x110   : > { %v851_v54 = vsel %vm787_vm2, %v755_v49, %v819_v52 }
 0x111   : > { %v867_v55 = vsel %vm803_vm3, %v771_v50, %v835_v53  ;;  %883 = vst.msk [vmem:[%s1305_s5 + $0x68] sm:$0xff] %vm224_vm0, %v851_v54 }
 0x112   : > { %899 = vst.msk [vmem:[%s1305_s5 + $0xe8] sm:$0xff] %vm224_vm0, %v867_v55 }
 0x113 PF: > { %s13_s14 = sadd.s32 1, %s1162_s14   ;;  %s1452_s12 = smov %s1158_s13 }
 0x114   : > { %p10_p5 = scmp.ge.s32.totalorder %s13_s14, 4   ;;  %s1453_s13 = smov %s1455_s15 }
 0x116   :  { %12 = sbr.rel (!%p10_p5) target bundleno = 2 (0x2), region = 73 }

</bundles_post_ra>
